<compile_context>
chip_gen: v6e
topology: v6e:2x2x1
jax: 0.10.0
libtpu: 0.0.40
codegen_flags: <defaults>
</compile_context>

<pallas_src>
import functools

import jax
import jax.numpy as jnp
import numpy as np
from jax.experimental import pallas as pl
from jax.experimental.pallas import tpu as pltpu


# ----------------------------------------------------------------------------
# Kernel: one (row-tile, batch) grid step == one fused MXU dot + bias + store.
# ----------------------------------------------------------------------------
def _gcn_kernel(lbig_ref, xw_ref, bias_ref, zr_ref, zi_ref, *, xw_resident):
    # lbig_ref : (tn, K*2N)            -- resident across the inner batch axis
    # xw_ref   : (B, K*2N, 2Fout) if resident else (1, K*2N, 2Fout)
    # bias_ref : (1, 2Fout)
    # zr_ref / zi_ref : (1, tn, Fout)
    b = pl.program_id(1) if xw_resident else 0
    acc = jnp.dot(lbig_ref[...], xw_ref[b],
                  preferred_element_type=jnp.float32)        # (tn, 2Fout), f32
    acc = acc + bias_ref[...]
    fout = zr_ref.shape[-1]
    zr_ref[0] = acc[:, :fout].astype(zr_ref.dtype)
    zi_ref[0] = acc[:, fout:].astype(zi_ref.dtype)


# ----------------------------------------------------------------------------
# Trace-time sizing helpers.
# ----------------------------------------------------------------------------
def _vmem_capacity_bytes():
    """Physical VMEM of the current part (conservative fallback = 64 MiB)."""
    try:
        info = pltpu.get_tpu_info()
        cap = getattr(info, "vmem_capacity_bytes", None)
        if cap:
            return int(cap)
    except Exception:
        pass
    return 64 << 20


def _pick_row_tile(n, k, itemsize, budget_bytes):
    """Largest divisor-of-N row tile (multiple of 8) whose (tile, K*2N) L block
    fits budget_bytes (one pipeline buffer); prefers 256/128/16 alignment."""
    bytes_per_row = k * 2 * n * itemsize
    max_rows = budget_bytes // max(bytes_per_row, 1)
    if n % 8 != 0 or max_rows >= n:
        return n
    divs = [d for d in range(8, n, 8) if n % d == 0]
    if not divs:
        return n
    fitting = [d for d in divs if d <= max_rows]
    if not fitting:
        return divs[0]                      # smallest legal tile
    best = max(fitting)
    for align in (256, 128, 16):            # MXU / bf16-sublane friendly sizes
        aligned = [d for d in fitting if d % align == 0]
        if aligned and 2 * max(aligned) >= best:
            return max(aligned)
    return best


# ----------------------------------------------------------------------------
# Wrapper.
# ----------------------------------------------------------------------------
@functools.partial(jax.jit,
                   static_argnames=("compute_dtype", "row_tile", "xw_resident"))
def gcn_layer_pallas(Lr, Li, Xr, Xi, Wr, Wi, br, bi,
                     compute_dtype=jnp.bfloat16, row_tile=None,
                     xw_resident=None):
    K, N, _ = Lr.shape
    B, _, Fin = Xr.shape
    Fout = Wr.shape[-1]
    itemsize = jnp.dtype(compute_dtype).itemsize

    # ---- generation-aware VMEM budgets (all static / trace-time) -----------
    vmem_cap = _vmem_capacity_bytes()
    if vmem_cap >= (100 << 20):             # 128-MiB parts: v5e / v6e
        l_budget, vmem_limit, xw_thresh = 24 << 20, 96 << 20, 8 << 20
    else:                                   # 64-MiB parts: v7x (per TC)
        l_budget, vmem_limit, xw_thresh = 6 << 20, 40 << 20, 4 << 20

    tn = row_tile if row_tile is not None else _pick_row_tile(N, K, itemsize,
                                                              l_budget)
    assert N % tn == 0 and (tn == N or tn % 8 == 0)
    num_nt = N // tn

    # ---- wrapper-side packing (Lbig is static per layer in a real model) ---
    # Lbig[n, k*2N + m] = [L^k_r | L^k_i][n, m]
    Lcat = jnp.concatenate([Lr, Li], axis=-1)                      # (K, N, 2N)
    Lbig = jnp.transpose(Lcat, (1, 0, 2)).reshape(N, K * 2 * N)
    Lbig = Lbig.astype(compute_dtype)                              # (N, K*2N)

    # Block-complex X / W, contracted once here (f32) -> XW stack.
    Xblk = jnp.concatenate(
        [jnp.concatenate([Xr, Xi], axis=-1),
         jnp.concatenate([-Xi, Xr], axis=-1)], axis=1)             # (B, 2N, 2Fin)
    Wblk = jnp.concatenate(
        [jnp.concatenate([Wr, Wi], axis=-1),
         jnp.concatenate([-Wi, Wr], axis=-1)], axis=1)             # (K, 2Fin, 2Fout)
    XW = jnp.einsum('bnf,kfo->bkno', Xblk, Wblk)                   # f32
    XW = XW.reshape(B, K * 2 * N, 2 * Fout).astype(compute_dtype)

    bias = jnp.concatenate(
        [jnp.sum(br - bi, axis=0), jnp.sum(br + bi, axis=0)],
        axis=-1).astype(jnp.float32)                               # (1, 2Fout)

    # ---- specs --------------------------------------------------------------
    xw_bytes = B * K * 2 * N * 2 * Fout * itemsize
    xw_res = xw_resident if xw_resident is not None else (xw_bytes <= xw_thresh)

    # L row-tile index is independent of the inner batch axis -> it stays
    # VMEM-resident while b advances (one HBM pass over the Laplacian).
    l_spec = pl.BlockSpec((tn, K * 2 * N), lambda nt, b: (nt, 0))
    if xw_res:
        xw_spec = pl.BlockSpec((B, K * 2 * N, 2 * Fout), lambda nt, b: (0, 0, 0))
    else:
        xw_spec = pl.BlockSpec((1, K * 2 * N, 2 * Fout), lambda nt, b: (b, 0, 0))
    bias_spec = pl.BlockSpec((1, 2 * Fout), lambda nt, b: (0, 0))

    out_dtype = jnp.float32   # keep reference-f32 output; bf16 would halve writes
    out_shape = (jax.ShapeDtypeStruct((B, N, Fout), out_dtype),
                 jax.ShapeDtypeStruct((B, N, Fout), out_dtype))
    out_specs = [pl.BlockSpec((1, tn, Fout), lambda nt, b: (b, nt, 0)),
                 pl.BlockSpec((1, tn, Fout), lambda nt, b: (b, nt, 0))]

    l_bytes = N * K * 2 * N * itemsize
    out_bytes = 2 * B * N * Fout * jnp.dtype(out_dtype).itemsize
    cost = pl.CostEstimate(
        flops=2 * B * N * (K * 2 * N) * (2 * Fout),
        transcendentals=0,
        bytes_accessed=l_bytes + (xw_bytes if xw_res else num_nt * xw_bytes)
                       + bias.size * 4 + out_bytes,
    )

    zr, zi = pl.pallas_call(
        functools.partial(_gcn_kernel, xw_resident=xw_res),
        out_shape=out_shape,
        grid_spec=pltpu.PrefetchScalarGridSpec(
            num_scalar_prefetch=0,
            grid=(num_nt, B),
            in_specs=[l_spec, xw_spec, bias_spec],
            out_specs=out_specs,
        ),
        compiler_params=pltpu.CompilerParams(
            # "arbitrary" on the batch axis: on v7x, megacore may only shard
            # the row-tile axis, so each core streams disjoint L rows.
            dimension_semantics=("parallel", "arbitrary"),
            vmem_limit_bytes=vmem_limit,
        ),
        cost_estimate=cost,
    )(Lbig, XW, bias)

    return zr, zi


# ----------------------------------------------------------------------------
# Glue + reference.
# ----------------------------------------------------------------------------
def calc_laplacian_powers(L, max_deg):
    """Same as GCNLayer.calc_laplacian_functions: (L, L@L, L@L@L, ...)."""
    res = [L]
    for _ in range(max_deg - 1):
        res.append(res[-1] @ L)
    return jnp.stack(res, axis=0)


def reference(Lr, Li, Xr, Xi, Wr, Wi, br, bi):
    Zr = jnp.zeros((Xr.shape[0], Xr.shape[1], Wr.shape[-1]), jnp.float32)
    Zi = jnp.zeros_like(Zr)
    for k in range(Lr.shape[0]):
        LXr = jnp.einsum('nm,bmf->bnf', Lr[k], Xr) - jnp.einsum('nm,bmf->bnf', Li[k], Xi)
        LXi = jnp.einsum('nm,bmf->bnf', Lr[k], Xi) + jnp.einsum('nm,bmf->bnf', Li[k], Xr)
        fr = LXr @ Wr[k] + br[k] - (LXi @ Wi[k] + bi[k])
        fi = LXi @ Wr[k] + br[k] + (LXr @ Wi[k] + bi[k])
        Zr = Zr + fr
        Zi = Zi + fi
    return Zr, Zi


if __name__ == "__main__":
    # small, forward-consistent shapes
    B, N, Fin, Fout, max_deg = 2, 16, 8, 32, 3

    key = jax.random.PRNGKey(0)
    k_lr, k_li, k_xr, k_xi, k_wr, k_wi, k_br, k_bi = jax.random.split(key, 8)

    # deterministic complex Laplacian (N x N), scaled for numerical sanity
    L_r = jax.random.normal(k_lr, (N, N), jnp.float32) * 0.2
    L_i = jax.random.normal(k_li, (N, N), jnp.float32) * 0.2
    L = (L_r + 1j * L_i).astype(jnp.complex64)
    L_powers = calc_laplacian_powers(L, max_deg)                    # (K, N, N)
    Lr = jnp.real(L_powers).astype(jnp.float32)
    Li = jnp.imag(L_powers).astype(jnp.float32)

    # inputs
    Xr = jax.random.normal(k_xr, (B, N, Fin), jnp.float32)
    Xi = jax.random.normal(k_xi, (B, N, Fin), jnp.float32)

    # deterministic ComplexLinear parameters per degree (synthetic init)
    bound = 1.0 / np.sqrt(Fin)
    Wr = jax.random.uniform(k_wr, (max_deg, Fin, Fout), jnp.float32, -bound, bound)
    Wi = jax.random.uniform(k_wi, (max_deg, Fin, Fout), jnp.float32, -bound, bound)
    br = jax.random.uniform(k_br, (max_deg, 1, Fout), jnp.float32, -bound, bound)
    bi = jax.random.uniform(k_bi, (max_deg, 1, Fout), jnp.float32, -bound, bound)

    Zr_ref, Zi_ref = reference(Lr, Li, Xr, Xi, Wr, Wi, br, bi)

    # exact-math check: f32 compute path, resident-XW spec, tight tolerance
    Zr32, Zi32 = gcn_layer_pallas(Lr, Li, Xr, Xi, Wr, Wi, br, bi,
                                  compute_dtype=jnp.float32)
    jax.block_until_ready((Zr32, Zi32))
    assert jnp.allclose(Zr32, Zr_ref, atol=1e-4, rtol=1e-4)
    assert jnp.allclose(Zi32, Zi_ref, atol=1e-4, rtol=1e-4)

    # exercise the streaming-XW spec too (f32, tight tolerance)
    Zr32s, Zi32s = gcn_layer_pallas(Lr, Li, Xr, Xi, Wr, Wi, br, bi,
                                    compute_dtype=jnp.float32, xw_resident=False)
    jax.block_until_ready((Zr32s, Zi32s))
    assert jnp.allclose(Zr32s, Zr_ref, atol=1e-4, rtol=1e-4)
    assert jnp.allclose(Zi32s, Zi_ref, atol=1e-4, rtol=1e-4)

    # fast default path: bf16 inputs + f32 accumulation (looser tolerance for
    # the bf16 input rounding; accumulation itself stays f32)
    Zr, Zi = gcn_layer_pallas(Lr, Li, Xr, Xi, Wr, Wi, br, bi)
    jax.block_until_ready((Zr, Zi))
    assert jnp.allclose(Zr, Zr_ref, atol=1e-1, rtol=1e-1)
    assert jnp.allclose(Zi, Zi_ref, atol=1e-1, rtol=1e-1)

    print("KERNEL_OK")
</pallas_src>

<mosaic_0001>
module attributes {stable_mosaic.version = 11 : i64} {
  func.func @_gcn_kernel(%arg0: i32, %arg1: i32, %arg2: memref<16x96xf32, #tpu.memory_space<vmem>>, %arg3: memref<2x96x64xf32, #tpu.memory_space<vmem>>, %arg4: memref<1x64xf32, #tpu.memory_space<vmem>>, %arg5: memref<1x16x32xf32, #tpu.memory_space<vmem>>, %arg6: memref<1x16x32xf32, #tpu.memory_space<vmem>>) attributes {dimension_semantics = [#tpu.dimension_semantics<parallel>, #tpu.dimension_semantics<arbitrary>], iteration_bounds = array<i64: 1, 2>, scalar_prefetch = 0 : i64, scratch_operands = 0 : i64, tpu.core_type = #tpu.core_type<tc>, window_params = [{transform_indices = @transform_0, window_bounds = array<i64: 16, 96>}, {pipeline_mode = #tpu.pipeline_mode<synchronous>, transform_indices = @transform_1, window_bounds = array<i64: 2, 96, 64>}, {pipeline_mode = #tpu.pipeline_mode<synchronous>, transform_indices = @transform_2, window_bounds = array<i64: 1, 64>}, {transform_indices = @transform_3, window_bounds = array<i64: 1, 16, 32>}, {transform_indices = @transform_4, window_bounds = array<i64: 1, 16, 32>}]} {
    %c0 = arith.constant 0 : index
    %c0_0 = arith.constant 0 : index
    %0 = vector.load %arg2[%c0, %c0_0] : memref<16x96xf32, #tpu.memory_space<vmem>>, vector<16x96xf32>
    %1 = arith.index_cast %arg1 : i32 to index
    %c0_1 = arith.constant 0 : index
    %c0_2 = arith.constant 0 : index
    %2 = vector.load %arg3[%1, %c0_1, %c0_2] : memref<2x96x64xf32, #tpu.memory_space<vmem>>, vector<1x96x64xf32>
    %3 = vector.shape_cast %2 : vector<1x96x64xf32> to vector<96x64xf32>
    %cst = arith.constant dense<0.000000e+00> : vector<16x64xf32>
    %4 = tpu.matmul %0, %3, %cst {dimension_numbers = #tpu.dot_dimension_numbers<[1], [0], [0], [1], [0, 0, 1, 1], [], []>} : vector<16x96xf32>, vector<96x64xf32>, vector<16x64xf32> -> vector<16x64xf32>
    %c0_3 = arith.constant 0 : index
    %c0_4 = arith.constant 0 : index
    %5 = vector.load %arg4[%c0_3, %c0_4] : memref<1x64xf32, #tpu.memory_space<vmem>>, vector<1x64xf32>
    %6 = vector.broadcast %5 : vector<1x64xf32> to vector<16x64xf32>
    %7 = arith.addf %4, %6 : vector<16x64xf32>
    %8 = vector.extract_strided_slice %7 {offsets = [0, 0], sizes = [16, 32], strides = [1, 1]} : vector<16x64xf32> to vector<16x32xf32>
    %c0_5 = arith.constant 0 : index
    %c0_6 = arith.constant 0 : index
    %c0_7 = arith.constant 0 : index
    %9 = vector.load %arg5[%c0_5, %c0_6, %c0_7] : memref<1x16x32xf32, #tpu.memory_space<vmem>>, vector<1x16x32xf32>
    %10 = vector.shape_cast %9 : vector<1x16x32xf32> to vector<16x32xf32>
    %11 = vector.shape_cast %8 : vector<16x32xf32> to vector<1x16x32xf32>
    tpu.vector_store %arg5[%c0_5, %c0_6, %c0_7], %11 {strides = array<i32>} : memref<1x16x32xf32, #tpu.memory_space<vmem>>, vector<1x16x32xf32>,
    %12 = vector.extract_strided_slice %7 {offsets = [0, 32], sizes = [16, 32], strides = [1, 1]} : vector<16x64xf32> to vector<16x32xf32>
    %c0_8 = arith.constant 0 : index
    %c0_9 = arith.constant 0 : index
    %c0_10 = arith.constant 0 : index
    %13 = vector.load %arg6[%c0_8, %c0_9, %c0_10] : memref<1x16x32xf32, #tpu.memory_space<vmem>>, vector<1x16x32xf32>
    %14 = vector.shape_cast %13 : vector<1x16x32xf32> to vector<16x32xf32>
    %15 = vector.shape_cast %12 : vector<16x32xf32> to vector<1x16x32xf32>
    tpu.vector_store %arg6[%c0_8, %c0_9, %c0_10], %15 {strides = array<i32>} : memref<1x16x32xf32, #tpu.memory_space<vmem>>, vector<1x16x32xf32>,
    return
  }
  func.func @transform_0(%arg0: i32, %arg1: i32) -> (i32, i32) {
    %c0_i32 = arith.constant 0 : i32
    %c0_i32_0 = arith.constant 0 : i32
    return %arg0, %c0_i32 : i32, i32
  }
  func.func @transform_1(%arg0: i32, %arg1: i32) -> (i32, i32, i32) {
    %c0_i32 = arith.constant 0 : i32
    %c0_i32_0 = arith.constant 0 : i32
    %c0_i32_1 = arith.constant 0 : i32
    %c0_i32_2 = arith.constant 0 : i32
    return %c0_i32, %c0_i32_0, %c0_i32_1 : i32, i32, i32
  }
  func.func @transform_2(%arg0: i32, %arg1: i32) -> (i32, i32) {
    %c0_i32 = arith.constant 0 : i32
    %c0_i32_0 = arith.constant 0 : i32
    %c0_i32_1 = arith.constant 0 : i32
    return %c0_i32, %c0_i32_0 : i32, i32
  }
  func.func @transform_3(%arg0: i32, %arg1: i32) -> (i32, i32, i32) {
    %c0_i32 = arith.constant 0 : i32
    %c0_i32_0 = arith.constant 0 : i32
    return %arg1, %arg0, %c0_i32 : i32, i32, i32
  }
  func.func @transform_4(%arg0: i32, %arg1: i32) -> (i32, i32, i32) {
    %c0_i32 = arith.constant 0 : i32
    %c0_i32_0 = arith.constant 0 : i32
    return %arg1, %arg0, %c0_i32 : i32, i32, i32
  }
}

</mosaic_0001>

<bundles_post_ra>
// kernel: neg.2
= control target key start
LH: loop header
LB: loop body
LE: loop exit
PB: predicated region body
PF: predicated region fallthrough
CT: control target
= control target key end

     0   :  { %s44_s0 = inlined_call_operand.vmem [shape: f32[2,16,8], index: 0, kind: input, shape index: {}]   ;;  %s45_s1 = inlined_call_operand.vmem [shape: bf16[2,16,8], index: 1, kind: output, shape index: {}]  }
   0x1   :  { %v2_v0 = vld [vmem:[%s44_s0] sm:$0xff]  ;;  %v18_v1 = vld [vmem:[%s44_s0 + $0x8] sm:$0xff] }
   0x2   :  { %v5_v2 = vxor.u32 2147483648, %v2_v0  ;;  %v13_v3 = vxor.u32 2147483648, %v18_v1 }
   0x4   :  { %v23_v4 = vpack.c.bf16 %v13_v3, %v5_v2 }
   0x6   :  { %24 = vst [vmem:[%s45_s1] sm:$0xff] %v23_v4  }

// kernel: neg.3
= control target key start
LH: loop header
LB: loop body
LE: loop exit
PB: predicated region body
PF: predicated region fallthrough
CT: control target
= control target key end

     0   :  { %v37_v7 = vmov 0.0   ;;  %s63_s0 = inlined_call_operand.vmem [shape: f32[3,8,32], index: 0, kind: input, shape index: {}]   ;;  %s64_s1 = inlined_call_operand.vmem [shape: bf16[3,8,32], index: 1, kind: output, shape index: {}]  }
   0x1   :  { %v2_v0 = vld [vmem:[%s63_s0] sm:$0xff]  ;;  %v27_v1 = vld [vmem:[%s63_s0 + $0x8] sm:$0xff]  ;;  %v29_v2 = vld [vmem:[%s63_s0 + $0x10] sm:$0xff] }
   0x2   :  { %v5_v3 = vxor.u32 2147483648, %v2_v0  ;;  %v13_v4 = vxor.u32 2147483648, %v27_v1  ;;  %v22_v5 = vxor.u32 2147483648, %v29_v2 }
   0x4   :  { %v34_v6 = vpack.c.bf16 %v13_v4, %v5_v3  ;;  %v25_v8 = vpack.c.bf16 %v37_v7, %v22_v5 }
   0x6   :  { %35 = vst [vmem:[%s64_s1] sm:$0xff] %v34_v6   ;;  %30 = vst [vmem:[%s64_s1 + $0x8] sm:$0xf] %v25_v8 }

// kernel: gcn_layer_pallas.1
= control target key start
LH: loop header
LB: loop body
LE: loop exit
PB: predicated region body
PF: predicated region fallthrough
CT: control target
= control target key end

     0   :  { %10 = vsyncpa [#allocation3], 0  ;;  %s948_s0 = inlined_call_operand.vmem [shape: f32[16,96], index: 0, kind: input, shape index: {}]   ;;  %s949_s1 = inlined_call_operand.vmem [shape: f32[2,96,64], index: 1, kind: input, shape index: {}]   ;;  %s950_s2 = inlined_call_operand.vmem [shape: f32[1,64], index: 2, kind: input, shape index: {}]   ;;  %s951_s3 = inlined_call_operand.hbm [shape: f32[2,16,32], index: 3, kind: output, shape index: {0}]   ;;  %s952_s4 = inlined_call_operand.hbm [shape: f32[2,16,32], index: 4, kind: output, shape index: {1}]  }
   0x1   :  { %12 = vsyncpa [#allocation3 + $0x1], 0 }
   0x2   :  { %13 = vsyncpa [#allocation5], 0 }
   0x3   :  { %15 = vsyncpa [#allocation5 + $0x1], 0  ;;  %s759_s15 = smov 0   ;;  %s761_s16 = smov 0  }
   0x4   :  { %s763_s17 = smov 0   ;;  %s765_s18 = smov 0  }
   0x5   :  { %s767_s19 = smov 0   ;;  %s769_s20 = smov 0  }
   0x6 LB: > { %s497_s21 = sadd.s32 4294967295, %s727_s20   ;;  %s498_s22 = sadd.s32 4294967294, %s727_s20   ;;  %s727_s20 = sphi %s769_s20, %s21_s20   ;;  %s723_s19 = sphi %s767_s19, %s959_s19   ;;  %s719_s18 = sphi %s765_s18, %s958_s18   ;;  %s715_s17 = sphi %s763_s17, %s957_s17   ;;  %s711_s16 = sphi %s761_s16, %s956_s16   ;;  %s707_s15 = sphi %s759_s15, %s955_s15  }
   0x7   : > { %s30_s23 = sadd.s32 1, %s723_s19  ;;  %s110_s24 = sadd.s32 1, %s715_s17 }
   0x8   : > { %p31_p0 = scmp.ge.s32.totalorder %s30_s23, 2  ;;  %p120_p1 = scmp.ne.s32.totalorder %s715_s17, %s711_s16 }
   0x9   : > { %p121_p2 = scmp.eq.s32.totalorder %s497_s21, 1  ;;  %p126_p3 = scmp.ne.s32.totalorder %s711_s16, %s707_s15 }
   0xa   : > { %s961_s23 = smov (%p31_p0, %s30_s23), 0  ;;  %p127_p5 = scmp.eq.s32.totalorder %s498_s22, 1 }
   0xb   : > { %p799_p4 = por %p121_p2, %p120_p1  ;;  %s105_s26 = ssub.s32 %s723_s19, %s961_s23 }
   0xc   : > { %p501_p6 = scmp.ge.s32.totalorder %s727_s20, 1  ;;  %p108_p7 = scmp.eq.s32.totalorder %s105_s26, 0 }
   0xd   : > { %p806_p8 = por %p127_p5, %p126_p3  ;;  %p188_p9 = scmp.lt.s32.totalorder %s727_s20, 3 }
   0xe   : > { %s812_s28 = scalar_select %p108_p7, %s715_s17, %s110_s24  }
   0xf   : > { %p189_p10 = pnand %p501_p6, %p188_p9 }
  0x10   : > { %s229_s29 = smul.u32 (!%p189_p10), 96, %s719_s18  ;;  %s841_s11 = sand.u32 (!%p189_p10), 1, %s711_s16  }
  0x11   : > { %192 = sbr.rel (%p189_p10) target bundleno = 384 (0x180), region = 32  ;;  %s502_s12 = sshll.u32 (!%p189_p10), %s841_s11, 4 }
  0x12   : > { %s822_s8 = scalar_lea.vmem (!%p189_p10), %s949_s1, %s229_s29  ;;  %s211_s21 = scalar_lea.vmem (!%p189_p10), [#allocation2], %s502_s12 }
  0x13   : > { %s366_s22 = sshll.u32 (!%p189_p10), %s211_s21, 4  ;;  %s515_s24 = sshll.u32 (!%p189_p10), %s719_s18, 8  ;;  %s850_s22 = int_to_ptr.vmem [resolvable:$true] %s366_s22 }
  0x14   : > { %s857_s30 = scalar_lea.hbm (!%p189_p10), %s951_s3, %s515_s24  ;;  %s729_s5 = smov (!%p189_p10), 96  }
  0x15   : > { %s346_s6 = scalar_lea.sflag (!%p189_p10), [#allocation3], %s841_s11  ;;  %s621_s7 = scalar_lea.vmem (!%p189_p10), %s850_s22, 256 }
  0x16   : > { %v227_v0 = vld [vmem:[%s948_s0] sm:$0xff]  ;;  %vm250_vm0 = vcmask 785408   ;;  %v242_v1 = vld [vmem:[%s822_s8 + $0x58] sm:$0xff]  ;;  %v241_v2 = vld [vmem:[%s822_s8 + $0x50] sm:$0xff]  ;;  %vm332_vm1 = vcmask 261120   ;;  %p622_p11 = scmp.ne.s32.totalorder %s850_s22, %s621_s7 }
  0x17   : > { %555 = vmatprep.mubr.msk.f32.mxu0 %vm250_vm0, %v227_v0  ;;  %531 = vmatprep.subr.mxu0 %v242_v1  ;;  %v240_v3 = vld [vmem:[%s822_s8 + $0x48] sm:$0xff]  ;;  %v239_v4 = vld [vmem:[%s822_s8 + $0x40] sm:$0xff]  ;;  %v238_v5 = vld [vmem:[%s822_s8 + $0x38] sm:$0xff] }
  0x18   : > { %532 = vmatpush3.msra.mxu0 %v242_v1  ;;  %v237_v6 = vld [vmem:[%s822_s8 + $0x30] sm:$0xff]  ;;  %v236_v7 = vld [vmem:[%s822_s8 + $0x28] sm:$0xff]  ;;  %v235_v8 = vld [vmem:[%s822_s8 + $0x20] sm:$0xff]  ;;  %p623_p12 = pnand %p622_p11, %p799_p4 }
  0x19   : > { %533 = vmatprep.subr.mxu0 %v241_v2  ;;  %v234_v9 = vld [vmem:[%s822_s8 + $0x18] sm:$0xff]  ;;  %v233_v10 = vld [vmem:[%s822_s8 + $0x10] sm:$0xff]  ;;  %v232_v11 = vld [vmem:[%s822_s8 + $0x8] sm:$0xff] }
  0x1a   : > { %534 = vmatpush3.msra.mxu0 %v241_v2  ;;  %v231_v12 = vld [vmem:[%s822_s8] sm:$0xff]  ;;  %v228_v13 = vld [vmem:[%s948_s0 + $0x8] sm:$0xff]  ;;  %p624_p13 = pneg %p623_p12  ;;  %s730_s8 = smov [#allocation2]  }
  0x1b   : > { %535 = vmatprep.subr.mxu0 %v240_v3  ;;  %v504_v14 = vld [vmem:[%s950_s2] ss:$0 sm:$0xff]  ;;  %s625_s9 = sshll.u32 %s730_s8, 4  ;;  %s626_s9 = int_to_ptr.vmem [resolvable:$false] %s625_s9 }
  0x1c   : > { %536 = vmatpush3.msra.mxu0 %v240_v3  ;;  %s627_s10 = scalar_lea.vmem %s626_s9, 512  ;;  %p628_p0 = scmp.lt.s32.totalorder %s850_s22, %s626_s9 }
  0x1d   : > { %537 = vmatprep.subr.mxu0 %v239_v4  ;;  %p629_p1 = scmp.lt.s32.totalorder %s627_s10, %s621_s7 }
  0x1e   : > { %538 = vmatpush3.msra.mxu0 %v239_v4 }
  0x1f   : > { %539 = vmatprep.subr.mxu0 %v238_v5  ;;  %p630_p2 = por %p629_p1, %p628_p0 }
  0x20   : > { %540 = vmatpush3.msra.mxu0 %v238_v5 }
  0x21   : > { %541 = vmatprep.subr.mxu0 %v237_v6  ;;  %p631_p3 = pnand %p630_p2, %p624_p13 }
  0x22   : > { %542 = vmatpush3.msra.mxu0 %v237_v6 }
  0x23   : > { %543 = vmatprep.subr.mxu0 %v236_v7 }
  0x24   : > { %544 = vmatpush3.msra.mxu0 %v236_v7 }
  0x25   : > { %545 = vmatprep.subr.mxu0 %v235_v8 }
  0x26   : > { %546 = vmatpush3.msra.mxu0 %v235_v8 }
  0x27   : > { %547 = vmatprep.subr.mxu0 %v234_v9 }
  0x28   : > { %548 = vmatpush3.msra.mxu0 %v234_v9 }
  0x29   : > { %549 = vmatprep.subr.mxu0 %v233_v10 }
  0x2a   : > { %550 = vmatpush3.msra.mxu0 %v233_v10 }
  0x2b   : > { %551 = vmatprep.subr.mxu0 %v232_v11 }
  0x2c   : > { %552 = vmatpush3.msra.mxu0 %v232_v11 }
  0x2d   : > { %553 = vmatprep.subr.mxu0 %v231_v12 }
  0x2e   : > { %554 = vmatpush3.msra.mxu0 %v231_v12 }
  0x2f   : > { %556 = vmatmul.mubr.msk.f32.vlgmr.msra.gmra.mxu0 %vm250_vm0, %v228_v13 }
  0xef   : > { %v557_v15 = vpop.f32.mrf.mxu0 }
  0xf0   : > { %v329_v16 = vadd.f32 %v557_v15, %v504_v14 }
  0xf1   : > { %v323_v17 = vpop.f32.mrf.mxu0 }
  0xf2   : > { %334 = vst.msk [vmem:[%s211_s21 + $0x8] sm:$0xff] %vm332_vm1, %v329_v16  ;;  %v324_v18 = vadd.f32 %v504_v14, %v323_v17 }
  0xf4   : > { %333 = vst.msk [vmem:[%s211_s21] sm:$0xff] %vm332_vm1, %v324_v18  ;;  %337 = vrot.lane.b32.xlu0 %v324_v18, %s729_s5 }
  0xf5   : > { %634 = shalt.err (!%p631_p3)
}
  0xf6   : > { %s635_s13 = scalar_lea.hbm %s857_s30, 256  ;;  %s639_s26 = scalar_lea.hbm %s951_s3, 512 }
  0xf7   : > { %p636_p5 = scmp.ne.s32.totalorder %s857_s30, %s635_s13  ;;  %p640_p9 = scmp.lt.s32.totalorder %s857_s30, %s951_s3 }
  0xf8   : > { %p641_p10 = scmp.lt.s32.totalorder %s639_s26, %s635_s13 }
  0xf9   : > { %p637_p6 = pnand %p636_p5, %p799_p4 }
  0xfa   : > { %p642_p11 = por %p641_p10, %p640_p9 }
  0xfb   : > { %p638_p7 = pneg %p637_p6 }
  0xfd   : > { %p643_p12 = pnand %p642_p11, %p638_p7 }
  0xff   : > { %646 = shalt.err (!%p643_p12)
}
 0x100   : > { %s731_s7 = smov 128   ;;  %s732_s9 = smov 8   ;;  %339 = vrot.lane.b32.xlu0 %v329_v16, %s729_s5 }
 0x101   : > { %558 = dma.vmem_to_hbm [thread:$0]  (%p799_p4), %s850_s22, 256, %s857_s30, %s346_s6, %s731_s7, %s731_s7, %s732_s9  }
 0x102   : > { %s218_s10 = scalar_lea.vmem [#allocation4], %s502_s12  ;;  %s899_s26 = scalar_lea.hbm %s952_s4, %s515_s24 }
 0x103   : > { %s384_s13 = sshll.u32 %s218_s10, 4  ;;  %s351_s22 = scalar_lea.sflag [#allocation5], %s841_s11  ;;  %s892_s13 = int_to_ptr.vmem [resolvable:$true] %s384_s13 }
 0x104   : > { %s647_s12 = scalar_lea.vmem %s892_s13, 256  ;;  %s733_s30 = smov [#allocation4]  }
 0x105   : > { %p648_p13 = scmp.ne.s32.totalorder %s892_s13, %s647_s12  ;;  %s651_s5 = sshll.u32 %s733_s30, 4  ;;  %s652_s5 = int_to_ptr.vmem [resolvable:$false] %s651_s5 }
 0x106   : > { %s653_s18 = scalar_lea.vmem %s652_s5, 512  ;;  %p654_p2 = scmp.lt.s32.totalorder %s892_s13, %s652_s5 }
 0x107   : > { %p649_p0 = pnand %p648_p13, %p799_p4  ;;  %p655_p3 = scmp.lt.s32.totalorder %s653_s18, %s647_s12 }
 0x109   : > { %p650_p1 = pneg %p649_p0  ;;  %p656_p5 = por %p655_p3, %p654_p2 }
 0x10b   : > { %p657_p6 = pnand %p656_p5, %p650_p1 }
 0x166   : > { %v338_v19 = vpop.permute.xlu0 %337 }
 0x167   : > { %343 = vst.msk [vmem:[%s218_s10] sm:$0xff] %vm332_vm1, %v338_v19 }
 0x172   : > { %v340_v20 = vpop.permute.xlu0 %339 }
 0x173   : > { %344 = vst.msk [vmem:[%s218_s10 + $0x8] sm:$0xff] %vm332_vm1, %v340_v20 }
 0x174   : > { %660 = shalt.err (!%p657_p6)
}
 0x175   : > { %s661_s24 = scalar_lea.hbm %s899_s26, 256  ;;  %s665_s29 = scalar_lea.hbm %s952_s4, 512 }
 0x176   : > { %p662_p7 = scmp.ne.s32.totalorder %s899_s26, %s661_s24  ;;  %p666_p11 = scmp.lt.s32.totalorder %s899_s26, %s952_s4 }
 0x177   : > { %p667_p12 = scmp.lt.s32.totalorder %s665_s29, %s661_s24 }
 0x178   : > { %p663_p9 = pnand %p662_p7, %p799_p4 }
 0x179   : > { %p668_p13 = por %p667_p12, %p666_p11 }
 0x17a   : > { %p664_p10 = pneg %p663_p9 }
 0x17c   : > { %p669_p0 = pnand %p668_p13, %p664_p10 }
 0x17e   : > { %672 = shalt.err (!%p669_p0)
}
 0x17f   : > { %559 = dma.vmem_to_hbm [thread:$0]  (%p799_p4), %s892_s13, 256, %s899_s26, %s351_s22, %s731_s7, %s731_s7, %s732_s9  }
 0x180 PF: > { %p569_p1 = scmp.ge.s32.totalorder %s727_s20, 2  ;;  %s399_s14 = sand.u32 1, %s707_s15  }
 0x181   : > { %s400_s21 = scalar_lea.sflag [#allocation3], %s399_s14 }
 0x182   : > { %p563_p2 = pnand %p569_p1, %p806_p8 }
 0x184   : > { %p564_p3 = pneg %p563_p2 }
 0x186   : > { %698 = dma.done.wait (%p564_p3), %s400_s21, 256  }
 0x187   : > { %700 = vsyncadd (%p564_p3), %s400_s21, 4294967040  ;;  %s409_s12 = scalar_lea.sflag [#allocation5], %s399_s14 }
 0x188   : > { %702 = dma.done.wait (%p564_p3), %s409_s12, 256  }
 0x189   : > { %704 = vsyncadd (%p564_p3), %s409_s12, 4294967040  ;;  %s21_s20 = sadd.s32 1, %s727_s20   ;;  %s955_s15 = smov %s711_s16 }
 0x18a   : > { %p18_p5 = scmp.ge.s32.totalorder %s21_s20, 4   ;;  %s956_s16 = smov %s715_s17 }
 0x18b   : > { %s957_s17 = smov %s812_s28  ;;  %s958_s18 = smov %s723_s19 }
 0x18c   : > { %s959_s19 = smov %s961_s23  ;;  %20 = sbr.rel (!%p18_p5) target bundleno = 6 (0x6), region = 85 }
 0x191   :  { %414 = vsyncpa [#allocation3], 1 }
 0x192   :  { %416 = vsyncpa [#allocation3 + $0x1], 1 }
 0x193   :  { %417 = vsyncpa [#allocation5], 1 }
 0x194   :  { %419 = vsyncpa [#allocation5 + $0x1], 1 }

</bundles_post_ra>
